<compile_context>
chip_gen: v5e
topology: v5e:2x2
jax: 0.10.0
libtpu: 0.0.40
codegen_flags: <defaults>
</compile_context>

<pallas_src>
import jax
import jax.numpy as jnp
from jax.experimental import pallas as pl
from jax.experimental.pallas import tpu as pltpu


def _copy_kernel(x_ref, o_ref):
    # Pure lane-dense identity copy; all reshapes happen (for free) outside.
    o_ref[...] = x_ref[...]


def _slab_and_block(total, itemsize):
    """Pick a lane-dense 2D slab shape (rows, lane) and a row-tiled block."""
    lane = None
    for cand in (1024, 512, 256, 128):
        if total % cand == 0:
            lane = cand
            break
    if lane is None:
        # Fallback: single un-tiled block (full-extent dims are always legal).
        return (1, total), (1, total)

    rows = total // lane

    if rows % 8 != 0:
        # Small case: full-extent block on the row axis (legal, single step).
        return (rows, lane), (rows, lane)

    # Largest power-of-two multiple of 8 that divides `rows` while keeping the
    # per-buffer block around <=2 MiB (VMEM-safe with double buffering of both
    # the input and the output on every TPU generation's default scoped limit).
    target_bytes = 2 * 1024 * 1024
    max_rows_by_vmem = max(8, target_bytes // (lane * itemsize))
    block_rows = 8
    d = 8
    while d <= min(rows, max_rows_by_vmem):
        if rows % d == 0:
            block_rows = d
        d *= 2
    return (rows, lane), (block_rows, lane)


def flatten_pallas(x):
    """Equivalent of Flatten().forward(x) for an NCHW tensor x."""
    n, c, h, w = x.shape
    total = n * c * h * w
    m = total // c  # == n * h * w ; matches view(-1, C) of contiguous memory
    itemsize = jnp.dtype(x.dtype).itemsize

    (rows, lane), (block_rows, block_lane) = _slab_and_block(total, itemsize)

    # Metadata-only reshape to a lane-dense 2D slab for the copy kernel.
    x2 = jnp.reshape(x, (rows, lane))

    grid = (rows // block_rows,)

    y2 = pl.pallas_call(
        _copy_kernel,
        out_shape=jax.ShapeDtypeStruct((rows, lane), x.dtype),
        grid=grid,
        in_specs=[pl.BlockSpec((block_rows, block_lane), lambda i: (i, 0))],
        out_specs=pl.BlockSpec((block_rows, block_lane), lambda i: (i, 0)),
        compiler_params=pltpu.CompilerParams(
            dimension_semantics=("parallel",),
        ),
        cost_estimate=pl.CostEstimate(
            flops=0,
            transcendentals=0,
            bytes_accessed=2 * total * itemsize,
        ),
    )(x2)

    # Metadata-only view back to the (N*H*W, C) shape torch's view(-1, C) gives.
    return jnp.reshape(y2, (m, c))


if __name__ == "__main__":
    key = jax.random.PRNGKey(0)
    # Small NCHW input consistent with a conv-net feature map.
    x = jax.random.normal(key, (2, 4, 16, 16), dtype=jnp.float32)

    out = flatten_pallas(x)
    out = jax.block_until_ready(out)

    # Reference: identical row-major reshape (== torch x.view(-1, x.shape[1]))
    ref = x.reshape(-1, x.shape[1])
    assert out.shape == ref.shape, (out.shape, ref.shape)
    assert out.dtype == ref.dtype
    assert bool(jnp.array_equal(out, ref)), "mismatch vs reference reshape"

    print("KERNEL_OK")
</pallas_src>

<mosaic_0001>
module attributes {stable_mosaic.version = 11 : i64} {
  func.func @_copy_kernel(%arg0: i32, %arg1: memref<2x1024xf32, #tpu.memory_space<vmem>>, %arg2: memref<2x1024xf32, #tpu.memory_space<vmem>>) attributes {dimension_semantics = [#tpu.dimension_semantics<parallel>], iteration_bounds = array<i64: 1>, scalar_prefetch = 0 : i64, scratch_operands = 0 : i64, tpu.core_type = #tpu.core_type<tc>, window_params = [{transform_indices = @transform_0, window_bounds = array<i64: 2, 1024>}, {transform_indices = @transform_1, window_bounds = array<i64: 2, 1024>}]} {
    %c0 = arith.constant 0 : index
    %c0_0 = arith.constant 0 : index
    %0 = vector.load %arg1[%c0, %c0_0] : memref<2x1024xf32, #tpu.memory_space<vmem>>, vector<2x1024xf32>
    %c0_1 = arith.constant 0 : index
    %c0_2 = arith.constant 0 : index
    %1 = vector.load %arg2[%c0_1, %c0_2] : memref<2x1024xf32, #tpu.memory_space<vmem>>, vector<2x1024xf32>
    tpu.vector_store %arg2[%c0_1, %c0_2], %0 {strides = array<i32>} : memref<2x1024xf32, #tpu.memory_space<vmem>>, vector<2x1024xf32>,
    return
  }
  func.func @transform_0(%arg0: i32) -> (i32, i32) {
    %c0_i32 = arith.constant 0 : i32
    %c0_i32_0 = arith.constant 0 : i32
    return %arg0, %c0_i32 : i32, i32
  }
  func.func @transform_1(%arg0: i32) -> (i32, i32) {
    %c0_i32 = arith.constant 0 : i32
    %c0_i32_0 = arith.constant 0 : i32
    return %arg0, %c0_i32 : i32, i32
  }
}

</mosaic_0001>

<bundles_post_ra>
// kernel: tpu_custom_call.1
= control target key start
LH: loop header
LB: loop body
LE: loop exit
PB: predicated region body
PF: predicated region fallthrough
CT: control target
= control target key end

     0   :  { %6 = vsyncpa [#allocation3], 0  ;;  %s116_s0 = inlined_call_operand.hbm [shape: f32[2,1024], index: 0, kind: input, shape index: {}]   ;;  %s117_s1 = inlined_call_operand.hbm [shape: f32[2,1024], index: 1, kind: output, shape index: {}]  }
   0x1   :  { %7 = vsyncpa [#allocation4], 0  ;;  %s13_s8 = sshll.u32 %s116_s0, 4  ;;  %s98_s9 = smov [#allocation2]   ;;  %s14_s8 = int_to_ptr.hbm [resolvable:$true] %s13_s8 }
   0x2   :  { %s15_s10 = sshll.u32 %s98_s9, 4  ;;  %s16_s10 = int_to_ptr.vmem [resolvable:$true] %s15_s10 }
   0x3   :  { %18 = dma.hbm_to_vmem [thread:$0]  %s14_s8, 256, %s16_s10, [#allocation3]  }
   0x4   :  { %94 = dma.done.wait [#allocation3], 256  }
   0x5   :  { %95 = vsyncadd [#allocation3], 4294967040  ;;  %s99_s11 = smov [#allocation5]   ;;  %s34_s15 = sshll.u32 %s117_s1, 4  ;;  %v23_v0 = vld [vmem:[#allocation2] sm:$0xff]  ;;  %v24_v1 = vld [vmem:[#allocation2 + $0x8] sm:$0xff]  ;;  %s35_s15 = int_to_ptr.hbm [resolvable:$true] %s34_s15 }
   0x6   :  { %s32_s12 = sshll.u32 %s99_s11, 4  ;;  %25 = vst [vmem:[#allocation5] sm:$0xff] %v23_v0  ;;  %s33_s12 = int_to_ptr.vmem [resolvable:$true] %s32_s12 }
   0x7   :  { %26 = vst [vmem:[#allocation5 + $0x8] sm:$0xff] %v24_v1 }
   0x8   :  { %37 = dma.vmem_to_hbm [thread:$0]  %s33_s12, 256, %s35_s15, [#allocation4]  }
   0x9   :  { %96 = dma.done.wait [#allocation4], 256  }
   0xa   :  { %97 = vsyncadd [#allocation4], 4294967040 }
   0xb   :  { %42 = vsyncpa [#allocation3], 1 }
   0xc   :  { %43 = vsyncpa [#allocation4], 1 }

</bundles_post_ra>
